<compile_context>
chip_gen: v7x
topology: tpu7x:2x2x1
jax: 0.10.0
libtpu: 0.0.40
codegen_flags: <defaults>
</compile_context>

<pallas_src>
import functools
import math

import jax
import jax.numpy as jnp
from jax.experimental import pallas as pl
from jax.experimental.pallas import tpu as pltpu


LANE = 128        # feature padding -> lane-dense loads/stores
SUBLANE = 8       # row-tile granularity
TM_MAX = 512      # largest row tile
TILE_MAX = 512    # largest N / K tile


def _round_up(x, m):
    return (x + m - 1) // m * m


def _choose_feature_tile(dim_padded):
    """Largest 128-multiple divisor of dim_padded that is <= TILE_MAX."""
    best = LANE
    for cand in range(LANE, min(dim_padded, TILE_MAX) + 1, LANE):
        if dim_padded % cand == 0:
            best = cand
    return best


def _choose_tm(rows):
    """Largest row tile whose total padding overhead stays small."""
    total = sum(rows)
    for tm in (512, 256, 128, 64, 32, 16, 8):
        padded = sum(_round_up(r, tm) for r in rows)
        if padded <= 1.25 * total + tm:
            return tm
    return SUBLANE


def _vmem_limit_bytes(tm, tn, tk):
    # double-buffered x/w/b tiles + double-buffered out + acc scratch, x4 slack
    tile_bytes = 4 * (2 * tm * tk + 2 * tk * tn + 2 * tn + 3 * tm * tn)
    return int(min(max(4 * tile_bytes, 32 << 20), 48 << 20))


# ----------------------------- Pallas kernel --------------------------------
def _fused_linear_kernel(lid_ref, x_ref, w_ref, b_ref, o_ref, acc_ref):
    # lid_ref : SMEM (num_row_tiles,) int32 -- layer id per row tile (consumed
    #           by the BlockSpec index_maps; not read in the body)
    # x_ref   : (TM, TK)
    # w_ref   : (1, TK, TN)   -- selected layer's W^T slab
    # b_ref   : (1, 1, TN)
    # o_ref   : (TM, TN)
    # acc_ref : VMEM (TM, TN) f32 accumulator
    kk = pl.program_id(2)

    @pl.when(kk == 0)
    def _():
        acc_ref[...] = jnp.zeros_like(acc_ref)

    acc_ref[...] += jnp.dot(x_ref[...], w_ref[0],
                            preferred_element_type=jnp.float32)

    @pl.when(kk == pl.num_programs(2) - 1)
    def _():
        o_ref[...] = (acc_ref[...] + b_ref[0]).astype(o_ref.dtype)


def _fused_linear(layer_ids, x, w_all, b_all, *, tm, tn, tk):
    """x: (M_total, dim_in_p); w_all: (k, dim_in_p, dim_out_p);
    b_all: (k, 1, dim_out_p); layer_ids: (M_total // tm,) int32."""
    m_total, dim_in_p = x.shape
    _, _, dim_out_p = w_all.shape
    grid = (m_total // tm, dim_out_p // tn, dim_in_p // tk)

    flops = 2 * m_total * dim_in_p * dim_out_p
    bytes_accessed = 4 * (x.size + w_all.size + b_all.size
                          + m_total * dim_out_p)

    return pl.pallas_call(
        _fused_linear_kernel,
        out_shape=jax.ShapeDtypeStruct((m_total, dim_out_p), x.dtype),
        grid_spec=pltpu.PrefetchScalarGridSpec(
            num_scalar_prefetch=1,
            grid=grid,
            in_specs=[
                # activations: (row tile, K tile)
                pl.BlockSpec((tm, tk), lambda i, j, kk, lid: (i, kk)),
                # weights: layer selected via scalar prefetch, (K tile, N tile)
                pl.BlockSpec((1, tk, tn),
                             lambda i, j, kk, lid: (lid[i], kk, j)),
                # bias: (N tile) of the selected layer
                pl.BlockSpec((1, 1, tn),
                             lambda i, j, kk, lid: (lid[i], 0, j)),
            ],
            out_specs=pl.BlockSpec((tm, tn), lambda i, j, kk, lid: (i, j)),
            scratch_shapes=[pltpu.VMEM((tm, tn), jnp.float32)],
        ),
        compiler_params=pltpu.CompilerParams(
            dimension_semantics=("parallel", "parallel", "arbitrary"),
            vmem_limit_bytes=_vmem_limit_bytes(tm, tn, tk),
        ),
        cost_estimate=pl.CostEstimate(
            flops=flops, transcendentals=0, bytes_accessed=bytes_accessed),
    )(layer_ids, x, w_all, b_all)


# ------------------------ Fused forward (jit, one HBM pass of glue) ----------
@functools.partial(
    jax.jit,
    static_argnames=("dim_in", "dim_out", "dim_in_p", "dim_out_p",
                     "tm", "tn", "tk"))
def _forward(tokens, w_all, b_all, *, dim_in, dim_out, dim_in_p, dim_out_p,
             tm, tn, tk):
    # 1) Flatten every token to (rows, dim_in) per the PyTorch branch rules.
    mats, out_shapes = [], []
    for t in tokens:
        if t.ndim == 3:
            t = t[:, 1:, :]                            # drop first seq position
            out_shapes.append(t.shape[:-1] + (dim_out,))
            mats.append(t.reshape(-1, dim_in))
        elif t.ndim == 2:
            out_shapes.append((t.shape[0], dim_out))
            mats.append(t)
        else:
            B, C, H, W = t.shape
            # TODO(synk): fold this transpose into the kernel.
            t = jnp.transpose(t.reshape(B, C, H * W), (0, 2, 1))
            out_shapes.append((B, H * W, dim_out))
            mats.append(t.reshape(-1, dim_in))

    # 2) Pack into one preallocated padded buffer (single fused scatter
    #    instead of per-token pad + concatenate) and build the tile->layer map.
    rows = [m.shape[0] for m in mats]
    offsets, layer_ids, off = [], [], 0
    for i, r in enumerate(rows):
        rp = _round_up(r, tm)
        offsets.append(off)
        layer_ids.extend([i] * (rp // tm))
        off += rp
    m_total = off

    x = jnp.zeros((m_total, dim_in_p), jnp.float32)
    for i, m in enumerate(mats):
        x = x.at[offsets[i]:offsets[i] + rows[i], :dim_in].set(
            m.astype(jnp.float32))
    lid = jnp.asarray(layer_ids, dtype=jnp.int32)

    # 3) One fused launch for all k layers.
    y = _fused_linear(lid, x, w_all, b_all, tm=tm, tn=tn, tk=tk)

    # 4) Slice each token's real rows / features back out.
    outs = []
    for i in range(len(mats)):
        yi = y[offsets[i]:offsets[i] + rows[i], :dim_out]
        outs.append(yi.reshape(out_shapes[i]).astype(tokens[i].dtype))
    return tuple(outs)


# ----------------------------- Module wrapper --------------------------------
class LinearLayerPallas:
    """JAX/Pallas port of the PyTorch LinearLayer module."""

    def __init__(self, dim_in, dim_out, k, key):
        self.dim_in = dim_in
        self.dim_out = dim_out
        self.k = k
        self.dim_in_p = _round_up(dim_in, LANE)
        self.dim_out_p = _round_up(dim_out, LANE)
        self.tk = _choose_feature_tile(self.dim_in_p)
        self.tn = _choose_feature_tile(self.dim_out_p)

        bound = 1.0 / math.sqrt(dim_in)
        self.weights = []   # unpadded, pre-transposed: (dim_in, dim_out)
        self.biases = []    # unpadded: (1, dim_out)
        for _ in range(k):
            kw, kb, key = jax.random.split(key, 3)
            w = jax.random.uniform(kw, (dim_out, dim_in), jnp.float32,
                                   minval=-bound, maxval=bound)
            b = jax.random.uniform(kb, (dim_out,), jnp.float32,
                                   minval=-bound, maxval=bound)
            self.weights.append(jnp.asarray(w.T))
            self.biases.append(jnp.asarray(b[None, :]))

        # Lane-dense (128-padded) stacked copies used by the fused kernel.
        w_all = jnp.zeros((k, self.dim_in_p, self.dim_out_p), jnp.float32)
        b_all = jnp.zeros((k, 1, self.dim_out_p), jnp.float32)
        for i in range(k):
            w_all = w_all.at[i, :dim_in, :dim_out].set(self.weights[i])
            b_all = b_all.at[i, :, :dim_out].set(self.biases[i])
        self.w_all = w_all
        self.b_all = b_all

    def __call__(self, tokens):
        tokens = tuple(tokens)

        # Row count per token (needed to pick TM before tracing).
        rows = []
        for t in tokens:
            if t.ndim == 3:
                rows.append(t.shape[0] * (t.shape[1] - 1))
            elif t.ndim == 2:
                rows.append(t.shape[0])
            else:
                B, C, H, W = t.shape
                rows.append(B * H * W)
        tm = min(TM_MAX, _choose_tm(rows))

        outs = _forward(tokens, self.w_all, self.b_all,
                        dim_in=self.dim_in, dim_out=self.dim_out,
                        dim_in_p=self.dim_in_p, dim_out_p=self.dim_out_p,
                        tm=tm, tn=self.tn, tk=self.tk)
        return list(outs)


# --------------------------------- Main ---------------------------------------
if __name__ == "__main__":
    key = jax.random.PRNGKey(0)
    k_param, k0, k1, k2 = jax.random.split(key, 4)

    dim_in, dim_out, k = 32, 32, 3
    layer = LinearLayerPallas(dim_in, dim_out, k, k_param)

    # Deterministic example inputs covering the 3-D, 2-D, and 4-D branches.
    tok3d = jax.random.normal(k0, (2, 9, dim_in), jnp.float32)      # (B, S, D)
    tok2d = jax.random.normal(k1, (4, dim_in), jnp.float32)         # (B, D)
    tok4d = jax.random.normal(k2, (2, dim_in, 4, 4), jnp.float32)   # NCHW, C == dim_in

    outs = layer([tok3d, tok2d, tok4d])
    outs = [jax.block_until_ready(o) for o in outs]

    # Sanity check against a plain-JAX reference (unpadded weights).
    ref3 = tok3d[:, 1:, :] @ layer.weights[0] + layer.biases[0]
    ref2 = tok2d @ layer.weights[1] + layer.biases[1]
    x4 = jnp.transpose(tok4d.reshape(2, dim_in, -1), (0, 2, 1))
    ref4 = x4 @ layer.weights[2] + layer.biases[2]

    assert outs[0].shape == (2, 8, dim_out)
    assert outs[1].shape == (4, dim_out)
    assert outs[2].shape == (2, 16, dim_out)
    assert jnp.allclose(outs[0], ref3, atol=1e-4)
    assert jnp.allclose(outs[1], ref2, atol=1e-4)
    assert jnp.allclose(outs[2], ref4, atol=1e-4)

    print("KERNEL_OK")
</pallas_src>

<mosaic_0001>
module attributes {stable_mosaic.version = 11 : i64} {
  func.func @_fused_linear_kernel(%arg0: i32, %arg1: i32, %arg2: i32, %arg3: memref<3xi32, #tpu.memory_space<smem>>, %arg4: memref<32x128xf32, #tpu.memory_space<vmem>>, %arg5: memref<1x128x128xf32, #tpu.memory_space<vmem>>, %arg6: memref<1x1x128xf32, #tpu.memory_space<vmem>>, %arg7: memref<32x128xf32, #tpu.memory_space<vmem>>, %arg8: memref<32x128xf32, #tpu.memory_space<vmem>>) attributes {dimension_semantics = [#tpu.dimension_semantics<parallel>, #tpu.dimension_semantics<parallel>, #tpu.dimension_semantics<arbitrary>], iteration_bounds = array<i64: 3, 1, 1>, scalar_prefetch = 1 : i64, scratch_operands = 1 : i64, tpu.core_type = #tpu.core_type<tc>, window_params = [{transform_indices = @transform_0, window_bounds = array<i64: 32, 128>}, {transform_indices = @transform_1, window_bounds = array<i64: 1, 128, 128>}, {transform_indices = @transform_2, window_bounds = array<i64: 1, 1, 128>}, {transform_indices = @transform_3, window_bounds = array<i64: 32, 128>}]} {
    %c0_i32 = arith.constant 0 : i32
    %0 = arith.cmpi eq, %arg2, %c0_i32 : i32
    %1 = arith.extui %0 : i1 to i32
    %c0_i32_0 = arith.constant 0 : i32
    %2 = arith.cmpi ne, %1, %c0_i32_0 : i32
    scf.if %2 {
      %cst_11 = arith.constant 0.000000e+00 : f32
      %13 = vector.broadcast %cst_11 : f32 to vector<32x128xf32>
      %c0_12 = arith.constant 0 : index
      %c0_13 = arith.constant 0 : index
      %14 = vector.load %arg8[%c0_12, %c0_13] : memref<32x128xf32, #tpu.memory_space<vmem>>, vector<32x128xf32>
      tpu.vector_store %arg8[%c0_12, %c0_13], %13 {strides = array<i32>} : memref<32x128xf32, #tpu.memory_space<vmem>>, vector<32x128xf32>,
    } else {
    }
    %c0 = arith.constant 0 : index
    %c0_1 = arith.constant 0 : index
    %3 = vector.load %arg8[%c0, %c0_1] : memref<32x128xf32, #tpu.memory_space<vmem>>, vector<32x128xf32>
    %c0_2 = arith.constant 0 : index
    %c0_3 = arith.constant 0 : index
    %4 = vector.load %arg4[%c0_2, %c0_3] : memref<32x128xf32, #tpu.memory_space<vmem>>, vector<32x128xf32>
    %c0_4 = arith.constant 0 : index
    %c0_5 = arith.constant 0 : index
    %c0_6 = arith.constant 0 : index
    %5 = vector.load %arg5[%c0_4, %c0_5, %c0_6] : memref<1x128x128xf32, #tpu.memory_space<vmem>>, vector<1x128x128xf32>
    %6 = vector.shape_cast %5 : vector<1x128x128xf32> to vector<128x128xf32>
    %cst = arith.constant dense<0.000000e+00> : vector<32x128xf32>
    %7 = tpu.matmul %4, %6, %cst {dimension_numbers = #tpu.dot_dimension_numbers<[1], [0], [0], [1], [0, 0, 1, 1], [], []>} : vector<32x128xf32>, vector<128x128xf32>, vector<32x128xf32> -> vector<32x128xf32>
    %8 = arith.addf %3, %7 : vector<32x128xf32>
    %c0_7 = arith.constant 0 : index
    %c0_8 = arith.constant 0 : index
    %9 = vector.load %arg8[%c0_7, %c0_8] : memref<32x128xf32, #tpu.memory_space<vmem>>, vector<32x128xf32>
    tpu.vector_store %arg8[%c0_7, %c0_8], %8 {strides = array<i32>} : memref<32x128xf32, #tpu.memory_space<vmem>>, vector<32x128xf32>,
    %c0_i32_9 = arith.constant 0 : i32
    %10 = arith.cmpi eq, %arg2, %c0_i32_9 : i32
    %11 = arith.extui %10 : i1 to i32
    %c0_i32_10 = arith.constant 0 : i32
    %12 = arith.cmpi ne, %11, %c0_i32_10 : i32
    scf.if %12 {
      %c0_11 = arith.constant 0 : index
      %c0_12 = arith.constant 0 : index
      %13 = vector.load %arg8[%c0_11, %c0_12] : memref<32x128xf32, #tpu.memory_space<vmem>>, vector<32x128xf32>
      %c0_13 = arith.constant 0 : index
      %c0_14 = arith.constant 0 : index
      %c0_15 = arith.constant 0 : index
      %14 = vector.load %arg6[%c0_13, %c0_14, %c0_15] : memref<1x1x128xf32, #tpu.memory_space<vmem>>, vector<1x1x128xf32>
      %15 = vector.shape_cast %14 : vector<1x1x128xf32> to vector<1x128xf32>
      %16 = vector.broadcast %15 : vector<1x128xf32> to vector<32x128xf32>
      %17 = arith.addf %13, %16 : vector<32x128xf32>
      %c0_16 = arith.constant 0 : index
      %c0_17 = arith.constant 0 : index
      %18 = vector.load %arg7[%c0_16, %c0_17] : memref<32x128xf32, #tpu.memory_space<vmem>>, vector<32x128xf32>
      tpu.vector_store %arg7[%c0_16, %c0_17], %17 {strides = array<i32>} : memref<32x128xf32, #tpu.memory_space<vmem>>, vector<32x128xf32>,
    } else {
    }
    return
  }
  func.func @transform_0(%arg0: i32, %arg1: i32, %arg2: i32, %arg3: memref<3xi32, #tpu.memory_space<smem>>) -> (i32, i32) {
    %c0_i32 = arith.constant 0 : i32
    return %arg0, %arg2 : i32, i32
  }
  func.func @transform_1(%arg0: i32, %arg1: i32, %arg2: i32, %arg3: memref<3xi32, #tpu.memory_space<smem>>) -> (i32, i32, i32) {
    %0 = arith.index_cast %arg0 : i32 to index
    %1 = memref.load %arg3[%0] : memref<3xi32, #tpu.memory_space<smem>>
    %c0_i32 = arith.constant 0 : i32
    return %1, %arg2, %arg1 : i32, i32, i32
  }
  func.func @transform_2(%arg0: i32, %arg1: i32, %arg2: i32, %arg3: memref<3xi32, #tpu.memory_space<smem>>) -> (i32, i32, i32) {
    %0 = arith.index_cast %arg0 : i32 to index
    %1 = memref.load %arg3[%0] : memref<3xi32, #tpu.memory_space<smem>>
    %c0_i32 = arith.constant 0 : i32
    %c0_i32_0 = arith.constant 0 : i32
    return %1, %c0_i32, %arg1 : i32, i32, i32
  }
  func.func @transform_3(%arg0: i32, %arg1: i32, %arg2: i32, %arg3: memref<3xi32, #tpu.memory_space<smem>>) -> (i32, i32) {
    %c0_i32 = arith.constant 0 : i32
    return %arg0, %arg1 : i32, i32
  }
}

</mosaic_0001>

<bundles_post_ra>
// kernel: _forward.1
= control target key start
LH: loop header
LB: loop body
LE: loop exit
PB: predicated region body
PF: predicated region fallthrough
CT: control target
= control target key end

     0   :  { %s1044_s0 = inlined_call_operand.vmem [shape: s32[3], index: 0, kind: input, shape index: {}]   ;;  %s1045_s1 = inlined_call_operand.vmem [shape: f32[96,128], index: 1, kind: input, shape index: {}]   ;;  %s1046_s2 = inlined_call_operand.hbm [shape: f32[3,128,128], index: 2, kind: input, shape index: {}]   ;;  %s1047_s3 = inlined_call_operand.vmem [shape: f32[3,1,128], index: 3, kind: input, shape index: {}]   ;;  %s1048_s4 = inlined_call_operand.vmem [shape: f32[96,128], index: 4, kind: output, shape index: {}]  }
   0x1   :  { %s9_s17 = sshll.u32 %s1044_s0, 4  ;;  %s10_s17 = int_to_ptr.vmem [resolvable:$true] %s9_s17 }
   0x2   :  { %s755_s18 = scalar_lea.vmem %s10_s17, 16  ;;  %p760_p1 = scmp.lt.s32.totalorder %s10_s17, %s10_s17 }
   0x3   :  { %p756_p0 = scmp.ne.s32.totalorder %s10_s17, %s755_s18  ;;  %p761_p2 = scmp.lt.s32.totalorder %s755_s18, %s755_s18 }
   0x5   :  { %p762_p3 = por %p761_p2, %p760_p1 }
   0x7   :  { %p763_p4 = pnand %p762_p3, %p756_p0 }
   0x9   :  { %766 = shalt.err (!%p763_p4)  }
   0xa   :  { %s851_s19 = smov [#allocation4]  }
   0xb   :  { %12 = dma.vmem_to_smem %s10_s17, 16, %s851_s19, [#allocation3] }
   0xc   :  { %821 = dma.done.wait [#allocation3], 16 }
   0xd   :  { %822 = vsyncadd [#allocation3], 4294967280 }
   0xe   :  { %14 = sfence }
   0xf   :  { %15 = vsyncpa [#allocation6], 0 }
  0x10   :  { %17 = vsyncpa [#allocation6 + $0x1], 0  ;;  %s883_s20 = smov 0   ;;  %s885_s21 = smov 0  }
  0x11   :  { %s887_s0 = smov 0   ;;  %s889_s22 = smov 0  }
  0x12   :  { %s891_s23 = smov 0   ;;  %s893_s24 = smov 0  }
  0x13 LB: > { %s42_s25 = sadd.s32 1, %s845_s23  ;;  %s570_s26 = sadd.s32 4294967295, %s849_s24   ;;  %s849_s24 = sphi %s893_s24, %s23_s24   ;;  %s845_s23 = sphi %s891_s23, %s1058_s23   ;;  %s841_s22 = sphi %s889_s22, %s1057_s22   ;;  %s837_s0 = sphi %s887_s0, %s1056_s0   ;;  %s833_s21 = sphi %s885_s21, %s1055_s21   ;;  %s829_s20 = sphi %s883_s20, %s1054_s20  }
  0x14   : > { %p44_p5 = scmp.ge.s32.totalorder %s42_s25, 3  ;;  %s74_s27 = sld [smem:[#allocation4 + %s845_s23]] }
  0x15   : > { %p90_p6 = scmp.ne.s32.totalorder %s837_s0, %s833_s21  ;;  %p91_p7 = scmp.eq.s32.totalorder %s849_s24, 0 }
  0x16   : > { %s1060_s25 = smov (%p44_p5, %s42_s25), 0  ;;  %p96_p8 = scmp.ne.s32.totalorder %s833_s21, %s829_s20 }
  0x17   : > { %s75_s28 = sld [smem:[#allocation4 + %s1060_s25]]  ;;  %p97_p9 = scmp.eq.s32.totalorder %s570_s26, 0 }
  0x18   : > { %s190_s30 = sand.u32 1, %s837_s0   ;;  %p92_p11 = por %p91_p7, %p90_p6 }
  0x19   : > { %p921_p10 = por %p97_p9, %p96_p8  ;;  %s83_s5 = sadd.s32 1, %s837_s0 }
  0x1a   : > { %p703_p12 = scmp.lt.s32.totalorder %s849_s24, 3  ;;  %s574_s7 = sshll.u32 %s190_s30, 7 }
  0x1b   : > { %s1050_s29 = scalar_select %p921_p10, 1, 0 }
  0x1c   : > { %p928_p0 = pnand %p703_p12, %p92_p11  ;;  %p577_p1 = scmp.ge.s32.totalorder %s849_s24, 1 }
  0x1d   : > { %s76_s6 = ssub.s32 %s74_s27, %s75_s28  ;;  %p224_p2 = scmp.lt.s32.totalorder %s849_s24, 4 }
  0x1e   : > { %p81_p13 = scmp.eq.s32.totalorder %s76_s6, 0  ;;  %s194_s13 = scalar_lea.vmem [#allocation5], %s574_s7 }
  0x1f   : > { %s693_s9 = scalar_select %p92_p11, [#allocation4], [#allocation7] }
  0x20   : > { %s933_s10 = scalar_select %p81_p13, %s837_s0, %s83_s5  }
  0x21   : > { %s694_s11 = scalar_select %p92_p11, %s845_s23, 0 }
  0x22   : > { %s1062_s9 = smov (!%p703_p12, %s693_s9), [#allocation8]  ;;  %s205_s14 = sshll.u32 %s194_s13, 4  ;;  %s942_s14 = int_to_ptr.vmem [resolvable:$true] %s205_s14 }
  0x23   : > { %s1064_s11 = smov (!%p703_p12, %s694_s11), 0  ;;  %p938_p3 = pnand %p577_p1, %p224_p2 }
  0x24   : > { %s195_s12 = sld [smem:[%s1062_s9 + %s1064_s11]]  ;;  %s949_s20 = scalar_lea.sflag [#allocation6], %s190_s30 }
  0x25   : > { %p769_p5 = pneg %p928_p0  ;;  %s772_s5 = scalar_lea.hbm %s1046_s2, 6144 }
  0x2a   : > { %s586_s16 = sshll.u32 %s195_s12, 11 }
  0x2b   : > { %s947_s19 = scalar_lea.hbm %s1046_s2, %s586_s16 }
  0x2c   : > { %s767_s26 = scalar_lea.hbm %s947_s19, 2048  ;;  %p773_p8 = scmp.lt.u32.totalorder %s947_s19, %s1046_s2 }
  0x2d   : > { %p768_p4 = scmp.ne.s32.totalorder %s947_s19, %s767_s26  ;;  %p774_p9 = scmp.lt.u32.totalorder %s772_s5, %s767_s26 }
  0x2e   : > { %p776_p12 = scmp.lt.u32.totalorder %s767_s26, %s947_s19 }
  0x2f   : > { %p770_p6 = pnand %p769_p5, %p768_p4  ;;  %p775_p11 = por %p774_p9, %p773_p8 }
  0x31   : > { %p771_p7 = pneg %p770_p6  ;;  %p777_p13 = por %p776_p12, %p775_p11 }
  0x33   : > { %p778_p1 = pnand %p777_p13, %p771_p7 }
  0x35   : > { %781 = shalt.err (!%p778_p1)
}
  0x36   : > { %s782_s30 = scalar_lea.vmem %s942_s14, 2048  ;;  %s852_s9 = smov [#allocation5]  }
  0x37   : > { %p783_p2 = scmp.ne.s32.totalorder %s942_s14, %s782_s30  ;;  %s787_s11 = sshll.u32 %s852_s9, 4  ;;  %s788_s11 = int_to_ptr.vmem [resolvable:$false] %s787_s11 }
  0x38   : > { %s789_s12 = scalar_lea.vmem %s788_s11, 4096  ;;  %p790_p10 = scmp.lt.s32.totalorder %s942_s14, %s788_s11 }
  0x39   : > { %p785_p4 = pnand %p783_p2, %p769_p5  ;;  %p791_p8 = scmp.lt.s32.totalorder %s789_s12, %s782_s30 }
  0x3b   : > { %p786_p6 = pneg %p785_p4  ;;  %p792_p9 = por %p791_p8, %p790_p10 }
  0x3d   : > { %p793_p11 = pnand %p792_p9, %p786_p6 }
  0x3f   : > { %796 = shalt.err (!%p793_p11)
}
  0x40   : > { %s853_s13 = smov 128   ;;  %s854_s16 = smov 8  }
  0x41   : > { %702 = dma.hbm_to_vmem [thread:$0]  (!%p928_p0), %s947_s19, 2048, %s942_s14, %s949_s20, %s853_s13, %s853_s13, %s854_s16  }
  0x42   : > { %228 = sbr.rel (%p938_p3) target bundleno = 325 (0x145), region = 32  ;;  %s230_s17 = sand.u32 (!%p938_p3), 1, %s833_s21  }
  0x43   : > { %s578_s18 = sshll.u32 (!%p938_p3), %s230_s17, 7  ;;  %s231_s26 = scalar_lea.sflag (!%p938_p3), [#allocation6], %s230_s17 }
  0x44   : > { %s980_s27 = scalar_lea.vmem (!%p938_p3), [#allocation5], %s578_s18  ;;  %p1053_p10 = scmp.ne.s32.totalorder (!%p938_p3), %s1050_s29, 0 }
  0x49   : > { %824 = dma.done.wait (%p1053_p10), %s231_s26, 2048  }
  0x4a   : > { %826 = vsyncadd (%p1053_p10), %s231_s26, 4294965248  ;;  %s579_s8 = sshll.u32 %s841_s22, 2  ;;  %v319_v0 = vld [vmem:[%s980_s27] sm:$0xff]  ;;  %v320_v1 = vld [vmem:[%s980_s27 + $0x8] sm:$0xff]  ;;  %s286_s20 = sld [smem:[#allocation4 + %s841_s22]] }
  0x4b   : > { %p276_p0 = scmp.lt.s32.totalorder %s579_s8, 11  ;;  %v321_v2 = vld [vmem:[%s980_s27 + $0x10] sm:$0xff]  ;;  %v645_v3 = vpack.c.bf16 %v320_v1, %v319_v0  ;;  %v322_v4 = vld [vmem:[%s980_s27 + $0x18] sm:$0xff]  ;;  %v323_v6 = vld [vmem:[%s980_s27 + $0x20] sm:$0xff] }
  0x4c   : > { %v649_v5 = vpack.c.bf16 %v322_v4, %v321_v2  ;;  %v324_v7 = vld [vmem:[%s980_s27 + $0x28] sm:$0xff]  ;;  %v325_v11 = vld [vmem:[%s980_s27 + $0x30] sm:$0xff]  ;;  %v326_v12 = vld [vmem:[%s980_s27 + $0x38] sm:$0xff] }
  0x4d   : > { %s1066_s8 = smov (!%p276_p0, %s579_s8), 11  ;;  %646 = vmatprep.subr.bf16.mxu0 %v645_v3  ;;  %677 = vmatprep.subr.bf16.mxu1 %v645_v3  ;;  %v653_v8 = vpack.c.bf16 %v324_v7, %v323_v6  ;;  %v657_v13 = vpack.c.bf16 %v326_v12, %v325_v11  ;;  %v327_v14 = vld [vmem:[%s980_s27 + $0x40] sm:$0xff]  ;;  %v328_v15 = vld [vmem:[%s980_s27 + $0x48] sm:$0xff]  ;;  %v329_v17 = vld [vmem:[%s980_s27 + $0x50] sm:$0xff] }
  0x4e   : > { %s580_s14 = sshll.u32 %s1066_s8, 3  ;;  %648 = vmatpush3.bf16.msra.mxu0 %v645_v3  ;;  %685 = vmatpush3.bf16.msra.mxu1 %v645_v3  ;;  %v661_v16 = vpack.c.bf16 %v328_v15, %v327_v14  ;;  %v330_v18 = vld [vmem:[%s980_s27 + $0x58] sm:$0xff]  ;;  %v331_v20 = vld [vmem:[%s980_s27 + $0x60] sm:$0xff]  ;;  %v332_v21 = vld [vmem:[%s980_s27 + $0x68] sm:$0xff] }
  0x4f   : > { %s1001_s19 = scalar_lea.vmem %s1045_s1, %s580_s14  ;;  %650 = vmatprep.subr.bf16.mxu0 %v649_v5  ;;  %678 = vmatprep.subr.bf16.mxu1 %v649_v5  ;;  %v665_v19 = vpack.c.bf16 %v330_v18, %v329_v17  ;;  %v669_v22 = vpack.c.bf16 %v332_v21, %v331_v20  ;;  %v333_v23 = vld [vmem:[%s980_s27 + $0x70] sm:$0xff]  ;;  %v334_v24 = vld [vmem:[%s980_s27 + $0x78] sm:$0xff]  ;;  %s301_s9 = scalar_lea.vmem %s1048_s4, %s580_s14 }
  0x50   : > { %v315_v9 = vld [vmem:[%s1001_s19] sm:$0xff]  ;;  %v317_v10 = vld [vmem:[%s1001_s19 + $0x10] sm:$0xff]  ;;  %v673_v25 = vpack.c.bf16 %v334_v24, %v333_v23  ;;  %v316_v26 = vld [vmem:[%s1001_s19 + $0x8] sm:$0xff]  ;;  %p287_p3 = scmp.lt.s32.totalorder %s286_s20, 2 }
  0x51   : > { %639 = vmatprep.mubr.f32.mxu0 %v315_v9  ;;  %642 = vmatprep.mubr.f32.mxu1 %v317_v10  ;;  %v318_v27 = vld [vmem:[%s1001_s19 + $0x18] sm:$0xff] }
  0x52   : > { %652 = vmatpush3.bf16.msra.mxu0 %v649_v5  ;;  %686 = vmatpush3.bf16.msra.mxu1 %v649_v5  ;;  %s1068_s20 = smov (!%p287_p3, %s286_s20), 2 }
  0x53   : > { %654 = vmatprep.subr.bf16.mxu0 %v653_v8  ;;  %679 = vmatprep.subr.bf16.mxu1 %v653_v8  ;;  %s292_s6 = scalar_lea.vmem %s1047_s3, %s1068_s20 }
  0x54   : > { %v583_v28 = vld [vmem:[%s292_s6] ss:$0 sm:$0xff] }
  0x56   : > { %656 = vmatpush3.bf16.msra.mxu0 %v653_v8  ;;  %687 = vmatpush3.bf16.msra.mxu1 %v653_v8 }
  0x57   : > { %658 = vmatprep.subr.bf16.mxu0 %v657_v13  ;;  %680 = vmatprep.subr.bf16.mxu1 %v657_v13 }
  0x5a   : > { %660 = vmatpush3.bf16.msra.mxu0 %v657_v13  ;;  %688 = vmatpush3.bf16.msra.mxu1 %v657_v13 }
  0x5b   : > { %662 = vmatprep.subr.bf16.mxu0 %v661_v16  ;;  %681 = vmatprep.subr.bf16.mxu1 %v661_v16 }
  0x5e   : > { %664 = vmatpush3.bf16.msra.mxu0 %v661_v16  ;;  %689 = vmatpush3.bf16.msra.mxu1 %v661_v16 }
  0x5f   : > { %666 = vmatprep.subr.bf16.mxu0 %v665_v19  ;;  %682 = vmatprep.subr.bf16.mxu1 %v665_v19 }
  0x62   : > { %668 = vmatpush3.bf16.msra.mxu0 %v665_v19  ;;  %690 = vmatpush3.bf16.msra.mxu1 %v665_v19 }
  0x63   : > { %670 = vmatprep.subr.bf16.mxu0 %v669_v22  ;;  %683 = vmatprep.subr.bf16.mxu1 %v669_v22 }
  0x66   : > { %672 = vmatpush3.bf16.msra.mxu0 %v669_v22  ;;  %691 = vmatpush3.bf16.msra.mxu1 %v669_v22 }
  0x67   : > { %674 = vmatprep.subr.bf16.mxu0 %v673_v25  ;;  %684 = vmatprep.subr.bf16.mxu1 %v673_v25 }
  0x6a   : > { %676 = vmatpush3.bf16.msra.mxu0 %v673_v25  ;;  %692 = vmatpush3.bf16.msra.mxu1 %v673_v25 }
  0x6d   : > { %640 = vmatmul.mubr.f32.vlgmr.msra.gmra.mrb[0].mxu0 %v316_v26  ;;  %643 = vmatmul.mubr.f32.vlgmr.msra.gmra.mrb[0].mxu1 %v318_v27 }
 0x140   : > { %v641_v29 = vpop.f32.mrb[0].mxu0  ;;  %v644_v30 = vpop.f32.mrb[0].mxu1 }
 0x141   : > { %v443_v31 = vadd.f32 %v641_v29, %v583_v28  ;;  %v445_v32 = vadd.f32 %v644_v30, %v583_v28  ;;  %v401_v33 = vpop.f32.mrb[1].mxu0  ;;  %v411_v34 = vpop.f32.mrb[1].mxu1 }
 0x142   : > { %v442_v35 = vadd.f32 %v583_v28, %v401_v33  ;;  %v444_v36 = vadd.f32 %v583_v28, %v411_v34 }
 0x143   : > { %447 = vst [vmem:[%s301_s9 + $0x8] sm:$0xff] %v443_v31  ;;  %449 = vst [vmem:[%s301_s9 + $0x18] sm:$0xff] %v445_v32 }
 0x144   : > { %446 = vst [vmem:[%s301_s9] sm:$0xff] %v442_v35  ;;  %448 = vst [vmem:[%s301_s9 + $0x10] sm:$0xff] %v444_v36 }
 0x145 PF: > { %s23_s24 = sadd.s32 1, %s849_s24   ;;  %s1054_s20 = smov %s833_s21 }
 0x146   : > { %p20_p5 = scmp.ge.s32.totalorder %s23_s24, 5   ;;  %s1055_s21 = smov %s837_s0 }
 0x147   : > { %s1056_s0 = smov %s933_s10  ;;  %s1057_s22 = smov %s845_s23 }
 0x148   : > { %s1058_s23 = smov %s1060_s25  ;;  %22 = sbr.rel (!%p20_p5) target bundleno = 19 (0x13), region = 86 }
 0x14f   :  { %478 = vsyncpa [#allocation6], 1 }
 0x150   :  { %480 = vsyncpa [#allocation6 + $0x1], 1 }

</bundles_post_ra>
